<compile_context>
chip_gen: v7x
topology: tpu7x:2x2x1
jax: 0.10.0
libtpu: 0.0.40
codegen_flags: <defaults>
</compile_context>

<pallas_src>
import math

import jax
import jax.numpy as jnp
from jax.experimental import pallas as pl
from jax.experimental.pallas import tpu as pltpu


def soft_q_kernel(s_ref, a_ref,
                  w1s_ref, w1a_ref, b1_ref,
                  w2_ref, b2_ref,
                  w3_ref, b3_ref,
                  w4_ref, b4_ref,
                  o_ref):
    """Batch-on-lanes: every activation is (features, bm); batch sits on the
    128-lane axis, so no transpose is ever needed and all elementwise ops and
    the final store are lane-dense."""
    mxu_dt = w2_ref.dtype                        # f32 (default) or bf16

    s = s_ref[...].astype(mxu_dt)                # (d_s, bm)
    a = a_ref[...].astype(mxu_dt)                # (d_a, bm)

    # layer 1: fused concat -> two MXU dots against the split, transposed W1
    h1 = jnp.dot(w1s_ref[...], s, preferred_element_type=jnp.float32)
    h1 = h1 + jnp.dot(w1a_ref[...], a, preferred_element_type=jnp.float32)
    h1 = jnp.maximum(h1 + b1_ref[...], 0.0)      # (H, bm) f32

    # layer 2
    h2 = jnp.dot(w2_ref[...], h1.astype(mxu_dt),
                 preferred_element_type=jnp.float32) + b2_ref[...]
    h2 = jnp.maximum(h2, 0.0)

    # layer 3
    h3 = jnp.dot(w3_ref[...], h2.astype(mxu_dt),
                 preferred_element_type=jnp.float32) + b3_ref[...]
    h3 = jnp.maximum(h3, 0.0)                    # (H, bm) f32

    # layer 4 (H -> 1): (1, H) @ (H, bm) -> dense (1, bm), direct store.
    q = jnp.dot(w4_ref[...], h3.astype(mxu_dt),
                preferred_element_type=jnp.float32) + b4_ref[...]
    o_ref[...] = q.astype(o_ref.dtype)


def prepare_params(params, num_inputs, *, compute_dtype=jnp.float32):
    """One-time parameter preparation (do NOT call per forward step).

    Splits W1 at the state/action boundary, transposes every weight to
    (out, in) for the batch-on-lanes layout, reshapes biases to column
    vectors, and casts MXU operands to `compute_dtype`.  Params are
    nn.Linear-equivalent, stored as W:(in, out), b:(out,).
    """
    (w1, b1), (w2, b2), (w3, b3), (w4, b4) = params
    w1s_t = jnp.asarray(w1[:num_inputs].T, compute_dtype)   # (H, d_s)
    w1a_t = jnp.asarray(w1[num_inputs:].T, compute_dtype)   # (H, d_a)
    w2_t = jnp.asarray(w2.T, compute_dtype)                 # (H, H)
    w3_t = jnp.asarray(w3.T, compute_dtype)                 # (H, H)
    w4_r = jnp.asarray(w4.reshape(1, -1), compute_dtype)    # (1, H)
    b1c = jnp.asarray(b1.reshape(-1, 1), jnp.float32)       # (H, 1)
    b2c = jnp.asarray(b2.reshape(-1, 1), jnp.float32)
    b3c = jnp.asarray(b3.reshape(-1, 1), jnp.float32)
    b4c = jnp.asarray(b4.reshape(1, 1), jnp.float32)        # (1, 1)
    return (w1s_t, w1a_t, b1c, w2_t, b2c, w3_t, b3c, w4_r, b4c)


def soft_q_forward(state, action, prepared, *, block_b=4096, core_parallel=False):
    """state: (B, num_inputs), action: (B, num_actions) -> (B, 1) Q-values.

    `prepared` comes from prepare_params().  On v7x pass
    block_b ~= round_up(B/2, 128) and core_parallel=True.
    """
    assert state.ndim == 2 and action.ndim == 2
    assert state.shape[0] == action.shape[0]
    B = state.shape[0]

    w1s_t, w1a_t, b1, w2_t, b2, w3_t, b3, w4_r, b4 = prepared
    H, d_s = w1s_t.shape
    d_a = w1a_t.shape[1]
    assert state.shape[1] == d_s and action.shape[1] == d_a

    # Batch-on-lanes operands: one trivial wrapper transpose of the small
    # (B, d) inputs removes all in-kernel XLU work.
    state_t = state.astype(jnp.float32).T        # (d_s, B)
    action_t = action.astype(jnp.float32).T      # (d_a, B)

    # Batch tiling.  Typical SAC batches (<= block_b) run as ONE grid step
    # (per-step overhead dominates this tiny network on v5e/v6e).  Larger B
    # tiles in multiples of 128 lanes; the ragged last tile is handled by
    # Pallas partial-block masking (no jnp.pad HBM pass) — valid because every
    # output column depends only on its own input column.
    if B <= block_b:
        bm, nb = B, 1
    else:
        assert block_b % 128 == 0, "block_b must be a multiple of 128"
        bm, nb = block_b, pl.cdiv(B, block_b)

    param_bytes = sum(int(p.size) * p.dtype.itemsize for p in prepared)
    io_bytes = (int(state_t.size) * state_t.dtype.itemsize
                + int(action_t.size) * action_t.dtype.itemsize + 4 * B)
    flops = 2 * B * H * (d_s + d_a + 2 * H + 1)

    # Explicit VMEM budget: double-buffered streamed tiles + resident params
    # (pipeline still keeps a second buffer for them) + h1/h2/h3 temporaries,
    # plus headroom.  Clamped to [16 MiB, 64 MiB] (v7x physical VMEM / TC).
    vmem_bytes = int(2 * 4 * bm * (d_s + d_a + 1)
                     + 2 * param_bytes
                     + 6 * 4 * bm * H
                     + (2 << 20))
    vmem_bytes = min(max(vmem_bytes, 16 << 20), 64 << 20)

    semantics = (pltpu.CORE_PARALLEL,) if core_parallel else ("parallel",)

    out = pl.pallas_call(
        soft_q_kernel,
        out_shape=jax.ShapeDtypeStruct((1, B), jnp.float32),
        grid=(nb,),
        in_specs=[
            pl.BlockSpec((d_s, bm), lambda i: (0, i)),   # state^T  (streamed)
            pl.BlockSpec((d_a, bm), lambda i: (0, i)),   # action^T (streamed)
            pl.BlockSpec((H, d_s), lambda i: (0, 0)),    # W1[:d_s]^T (resident)
            pl.BlockSpec((H, d_a), lambda i: (0, 0)),    # W1[d_s:]^T (resident)
            pl.BlockSpec((H, 1), lambda i: (0, 0)),      # b1
            pl.BlockSpec((H, H), lambda i: (0, 0)),      # W2^T
            pl.BlockSpec((H, 1), lambda i: (0, 0)),      # b2
            pl.BlockSpec((H, H), lambda i: (0, 0)),      # W3^T
            pl.BlockSpec((H, 1), lambda i: (0, 0)),      # b3
            pl.BlockSpec((1, H), lambda i: (0, 0)),      # W4 row
            pl.BlockSpec((1, 1), lambda i: (0, 0)),      # b4
        ],
        out_specs=pl.BlockSpec((1, bm), lambda i: (0, i)),   # batch on lanes
        compiler_params=pltpu.CompilerParams(
            dimension_semantics=semantics,
            vmem_limit_bytes=vmem_bytes),
        cost_estimate=pl.CostEstimate(
            flops=flops, transcendentals=0,
            bytes_accessed=int(param_bytes + io_bytes)),
    )(state_t, action_t, *prepared)

    # (1, B) with batch on lanes -> PyTorch-style (B, 1)
    return out.reshape(B, 1)


def init_params(key, num_inputs, num_actions, hidden_size, init_w=0.003):
    """nn.Linear-style init; last layer uniform(-init_w, init_w).
    Weights stored as (in, out); biases as (out,)."""
    def linear(k, fan_in, fan_out, bound):
        kw, kb = jax.random.split(k)
        w = jax.random.uniform(kw, (fan_in, fan_out), jnp.float32, -bound, bound)
        b = jax.random.uniform(kb, (fan_out,), jnp.float32, -bound, bound)
        return w, b

    k1, k2, k3, k4 = jax.random.split(key, 4)
    d_in = num_inputs + num_actions
    p1 = linear(k1, d_in, hidden_size, 1.0 / math.sqrt(d_in))
    p2 = linear(k2, hidden_size, hidden_size, 1.0 / math.sqrt(hidden_size))
    p3 = linear(k3, hidden_size, hidden_size, 1.0 / math.sqrt(hidden_size))
    p4 = linear(k4, hidden_size, 1, init_w)
    return (p1, p2, p3, p4)


def reference(state, action, params):
    x = jnp.concatenate([state, action], axis=1)
    (w1, b1), (w2, b2), (w3, b3), (w4, b4) = params
    h = jnp.maximum(x @ w1 + b1, 0.0)
    h = jnp.maximum(h @ w2 + b2, 0.0)
    h = jnp.maximum(h @ w3 + b3, 0.0)
    return h @ w4 + b4


if __name__ == "__main__":
    num_inputs, num_actions, hidden_size = 24, 8, 32

    key = jax.random.PRNGKey(0)
    k_params, k_s, k_a, k_s2, k_a2 = jax.random.split(key, 5)
    params = init_params(k_params, num_inputs, num_actions, hidden_size)

    # One-time param prep (split / transpose / reshape / cast) outside the
    # jitted forward, as recommended by the review.
    prepared = prepare_params(params, num_inputs)

    fwd = jax.jit(soft_q_forward, static_argnames=("block_b", "core_parallel"))

    # small batch: single grid step (block == full array)
    batch = 8
    state = jax.random.normal(k_s, (batch, num_inputs), jnp.float32)
    action = jax.random.normal(k_a, (batch, num_actions), jnp.float32)
    q = fwd(state, action, prepared)
    jax.block_until_ready(q)
    ref = reference(state, action, params)
    assert q.shape == (batch, 1)
    assert jnp.allclose(q, ref, atol=1e-4, rtol=1e-4)

    # larger batch: exercises the batch grid (2 tiles), the ragged last tile
    # via Pallas partial-block masking (no jnp.pad), VMEM-resident weights and
    # the lane-dense (1, bm) writeback.
    batch2 = 1000
    state2 = jax.random.normal(k_s2, (batch2, num_inputs), jnp.float32)
    action2 = jax.random.normal(k_a2, (batch2, num_actions), jnp.float32)
    q2 = fwd(state2, action2, prepared, block_b=512)
    jax.block_until_ready(q2)
    ref2 = reference(state2, action2, params)
    assert q2.shape == (batch2, 1)
    assert jnp.allclose(q2, ref2, atol=1e-4, rtol=1e-4)

    print("KERNEL_OK")
</pallas_src>

<mosaic_0001>
module attributes {stable_mosaic.version = 11 : i64} {
  func.func @soft_q_kernel(%arg0: i32, %arg1: memref<24x8xf32, #tpu.memory_space<vmem>>, %arg2: memref<8x8xf32, #tpu.memory_space<vmem>>, %arg3: memref<32x24xf32, #tpu.memory_space<vmem>>, %arg4: memref<32x8xf32, #tpu.memory_space<vmem>>, %arg5: memref<32x1xf32, #tpu.memory_space<vmem>>, %arg6: memref<32x32xf32, #tpu.memory_space<vmem>>, %arg7: memref<32x1xf32, #tpu.memory_space<vmem>>, %arg8: memref<32x32xf32, #tpu.memory_space<vmem>>, %arg9: memref<32x1xf32, #tpu.memory_space<vmem>>, %arg10: memref<1x32xf32, #tpu.memory_space<vmem>>, %arg11: memref<1x1xf32, #tpu.memory_space<vmem>>, %arg12: memref<1x8xf32, #tpu.memory_space<vmem>>) attributes {dimension_semantics = [#tpu.dimension_semantics<parallel>], iteration_bounds = array<i64: 1>, scalar_prefetch = 0 : i64, scratch_operands = 0 : i64, tpu.core_type = #tpu.core_type<tc>, window_params = [{transform_indices = @transform_0, window_bounds = array<i64: 24, 8>}, {transform_indices = @transform_1, window_bounds = array<i64: 8, 8>}, {pipeline_mode = #tpu.pipeline_mode<synchronous>, transform_indices = @transform_2, window_bounds = array<i64: 32, 24>}, {pipeline_mode = #tpu.pipeline_mode<synchronous>, transform_indices = @transform_3, window_bounds = array<i64: 32, 8>}, {pipeline_mode = #tpu.pipeline_mode<synchronous>, transform_indices = @transform_4, window_bounds = array<i64: 32, 1>}, {pipeline_mode = #tpu.pipeline_mode<synchronous>, transform_indices = @transform_5, window_bounds = array<i64: 32, 32>}, {pipeline_mode = #tpu.pipeline_mode<synchronous>, transform_indices = @transform_6, window_bounds = array<i64: 32, 1>}, {pipeline_mode = #tpu.pipeline_mode<synchronous>, transform_indices = @transform_7, window_bounds = array<i64: 32, 32>}, {pipeline_mode = #tpu.pipeline_mode<synchronous>, transform_indices = @transform_8, window_bounds = array<i64: 32, 1>}, {pipeline_mode = #tpu.pipeline_mode<synchronous>, transform_indices = @transform_9, window_bounds = array<i64: 1, 32>}, {pipeline_mode = #tpu.pipeline_mode<synchronous>, transform_indices = @transform_10, window_bounds = array<i64: 1, 1>}, {transform_indices = @transform_11, window_bounds = array<i64: 1, 8>}]} {
    %c0 = arith.constant 0 : index
    %c0_0 = arith.constant 0 : index
    %0 = vector.load %arg1[%c0, %c0_0] : memref<24x8xf32, #tpu.memory_space<vmem>>, vector<24x8xf32>
    %c0_1 = arith.constant 0 : index
    %c0_2 = arith.constant 0 : index
    %1 = vector.load %arg2[%c0_1, %c0_2] : memref<8x8xf32, #tpu.memory_space<vmem>>, vector<8x8xf32>
    %c0_3 = arith.constant 0 : index
    %c0_4 = arith.constant 0 : index
    %2 = vector.load %arg3[%c0_3, %c0_4] : memref<32x24xf32, #tpu.memory_space<vmem>>, vector<32x24xf32>
    %cst = arith.constant dense<0.000000e+00> : vector<32x8xf32>
    %3 = tpu.matmul %2, %0, %cst {dimension_numbers = #tpu.dot_dimension_numbers<[1], [0], [0], [1], [0, 0, 1, 1], [], []>} : vector<32x24xf32>, vector<24x8xf32>, vector<32x8xf32> -> vector<32x8xf32>
    %c0_5 = arith.constant 0 : index
    %c0_6 = arith.constant 0 : index
    %4 = vector.load %arg4[%c0_5, %c0_6] : memref<32x8xf32, #tpu.memory_space<vmem>>, vector<32x8xf32>
    %cst_7 = arith.constant dense<0.000000e+00> : vector<32x8xf32>
    %5 = tpu.matmul %4, %1, %cst_7 {dimension_numbers = #tpu.dot_dimension_numbers<[1], [0], [0], [1], [0, 0, 1, 1], [], []>} : vector<32x8xf32>, vector<8x8xf32>, vector<32x8xf32> -> vector<32x8xf32>
    %6 = arith.addf %3, %5 : vector<32x8xf32>
    %c0_8 = arith.constant 0 : index
    %c0_9 = arith.constant 0 : index
    %7 = vector.load %arg5[%c0_8, %c0_9] : memref<32x1xf32, #tpu.memory_space<vmem>>, vector<32x1xf32>
    %8 = vector.broadcast %7 : vector<32x1xf32> to vector<32x8xf32>
    %9 = arith.addf %6, %8 : vector<32x8xf32>
    %cst_10 = arith.constant 0.000000e+00 : f32
    %10 = vector.broadcast %cst_10 : f32 to vector<32x8xf32>
    %11 = arith.maximumf %9, %10 : vector<32x8xf32>
    %c0_11 = arith.constant 0 : index
    %c0_12 = arith.constant 0 : index
    %12 = vector.load %arg6[%c0_11, %c0_12] : memref<32x32xf32, #tpu.memory_space<vmem>>, vector<32x32xf32>
    %cst_13 = arith.constant dense<0.000000e+00> : vector<32x8xf32>
    %13 = tpu.matmul %12, %11, %cst_13 {dimension_numbers = #tpu.dot_dimension_numbers<[1], [0], [0], [1], [0, 0, 1, 1], [], []>} : vector<32x32xf32>, vector<32x8xf32>, vector<32x8xf32> -> vector<32x8xf32>
    %c0_14 = arith.constant 0 : index
    %c0_15 = arith.constant 0 : index
    %14 = vector.load %arg7[%c0_14, %c0_15] : memref<32x1xf32, #tpu.memory_space<vmem>>, vector<32x1xf32>
    %15 = vector.broadcast %14 : vector<32x1xf32> to vector<32x8xf32>
    %16 = arith.addf %13, %15 : vector<32x8xf32>
    %cst_16 = arith.constant 0.000000e+00 : f32
    %17 = vector.broadcast %cst_16 : f32 to vector<32x8xf32>
    %18 = arith.maximumf %16, %17 : vector<32x8xf32>
    %c0_17 = arith.constant 0 : index
    %c0_18 = arith.constant 0 : index
    %19 = vector.load %arg8[%c0_17, %c0_18] : memref<32x32xf32, #tpu.memory_space<vmem>>, vector<32x32xf32>
    %cst_19 = arith.constant dense<0.000000e+00> : vector<32x8xf32>
    %20 = tpu.matmul %19, %18, %cst_19 {dimension_numbers = #tpu.dot_dimension_numbers<[1], [0], [0], [1], [0, 0, 1, 1], [], []>} : vector<32x32xf32>, vector<32x8xf32>, vector<32x8xf32> -> vector<32x8xf32>
    %c0_20 = arith.constant 0 : index
    %c0_21 = arith.constant 0 : index
    %21 = vector.load %arg9[%c0_20, %c0_21] : memref<32x1xf32, #tpu.memory_space<vmem>>, vector<32x1xf32>
    %22 = vector.broadcast %21 : vector<32x1xf32> to vector<32x8xf32>
    %23 = arith.addf %20, %22 : vector<32x8xf32>
    %cst_22 = arith.constant 0.000000e+00 : f32
    %24 = vector.broadcast %cst_22 : f32 to vector<32x8xf32>
    %25 = arith.maximumf %23, %24 : vector<32x8xf32>
    %c0_23 = arith.constant 0 : index
    %c0_24 = arith.constant 0 : index
    %26 = vector.load %arg10[%c0_23, %c0_24] : memref<1x32xf32, #tpu.memory_space<vmem>>, vector<1x32xf32>
    %cst_25 = arith.constant dense<0.000000e+00> : vector<1x8xf32>
    %27 = tpu.matmul %26, %25, %cst_25 {dimension_numbers = #tpu.dot_dimension_numbers<[1], [0], [0], [1], [0, 0, 1, 1], [], []>} : vector<1x32xf32>, vector<32x8xf32>, vector<1x8xf32> -> vector<1x8xf32>
    %c0_26 = arith.constant 0 : index
    %c0_27 = arith.constant 0 : index
    %28 = vector.load %arg11[%c0_26, %c0_27] : memref<1x1xf32, #tpu.memory_space<vmem>>, vector<1x1xf32>
    %29 = vector.broadcast %28 : vector<1x1xf32> to vector<1x8xf32>
    %30 = arith.addf %27, %29 : vector<1x8xf32>
    %c0_28 = arith.constant 0 : index
    %c0_29 = arith.constant 0 : index
    %31 = vector.load %arg12[%c0_28, %c0_29] : memref<1x8xf32, #tpu.memory_space<vmem>>, vector<1x8xf32>
    tpu.vector_store %arg12[%c0_28, %c0_29], %30 {strides = array<i32>} : memref<1x8xf32, #tpu.memory_space<vmem>>, vector<1x8xf32>,
    return
  }
  func.func @transform_0(%arg0: i32) -> (i32, i32) {
    %c0_i32 = arith.constant 0 : i32
    %c0_i32_0 = arith.constant 0 : i32
    return %c0_i32, %arg0 : i32, i32
  }
  func.func @transform_1(%arg0: i32) -> (i32, i32) {
    %c0_i32 = arith.constant 0 : i32
    %c0_i32_0 = arith.constant 0 : i32
    return %c0_i32, %arg0 : i32, i32
  }
  func.func @transform_2(%arg0: i32) -> (i32, i32) {
    %c0_i32 = arith.constant 0 : i32
    %c0_i32_0 = arith.constant 0 : i32
    %c0_i32_1 = arith.constant 0 : i32
    return %c0_i32, %c0_i32_0 : i32, i32
  }
  func.func @transform_3(%arg0: i32) -> (i32, i32) {
    %c0_i32 = arith.constant 0 : i32
    %c0_i32_0 = arith.constant 0 : i32
    %c0_i32_1 = arith.constant 0 : i32
    return %c0_i32, %c0_i32_0 : i32, i32
  }
  func.func @transform_4(%arg0: i32) -> (i32, i32) {
    %c0_i32 = arith.constant 0 : i32
    %c0_i32_0 = arith.constant 0 : i32
    %c0_i32_1 = arith.constant 0 : i32
    return %c0_i32, %c0_i32_0 : i32, i32
  }
  func.func @transform_5(%arg0: i32) -> (i32, i32) {
    %c0_i32 = arith.constant 0 : i32
    %c0_i32_0 = arith.constant 0 : i32
    %c0_i32_1 = arith.constant 0 : i32
    return %c0_i32, %c0_i32_0 : i32, i32
  }
  func.func @transform_6(%arg0: i32) -> (i32, i32) {
    %c0_i32 = arith.constant 0 : i32
    %c0_i32_0 = arith.constant 0 : i32
    %c0_i32_1 = arith.constant 0 : i32
    return %c0_i32, %c0_i32_0 : i32, i32
  }
  func.func @transform_7(%arg0: i32) -> (i32, i32) {
    %c0_i32 = arith.constant 0 : i32
    %c0_i32_0 = arith.constant 0 : i32
    %c0_i32_1 = arith.constant 0 : i32
    return %c0_i32, %c0_i32_0 : i32, i32
  }
  func.func @transform_8(%arg0: i32) -> (i32, i32) {
    %c0_i32 = arith.constant 0 : i32
    %c0_i32_0 = arith.constant 0 : i32
    %c0_i32_1 = arith.constant 0 : i32
    return %c0_i32, %c0_i32_0 : i32, i32
  }
  func.func @transform_9(%arg0: i32) -> (i32, i32) {
    %c0_i32 = arith.constant 0 : i32
    %c0_i32_0 = arith.constant 0 : i32
    %c0_i32_1 = arith.constant 0 : i32
    return %c0_i32, %c0_i32_0 : i32, i32
  }
  func.func @transform_10(%arg0: i32) -> (i32, i32) {
    %c0_i32 = arith.constant 0 : i32
    %c0_i32_0 = arith.constant 0 : i32
    %c0_i32_1 = arith.constant 0 : i32
    return %c0_i32, %c0_i32_0 : i32, i32
  }
  func.func @transform_11(%arg0: i32) -> (i32, i32) {
    %c0_i32 = arith.constant 0 : i32
    %c0_i32_0 = arith.constant 0 : i32
    return %c0_i32, %arg0 : i32, i32
  }
}

</mosaic_0001>

<bundles_post_ra>
// kernel: soft_q_forward.1
= control target key start
LH: loop header
LB: loop body
LE: loop exit
PB: predicated region body
PF: predicated region fallthrough
CT: control target
= control target key end

     0   :  { %s1006_s0 = inlined_call_operand.vmem [shape: f32[24,8], index: 0, kind: input, shape index: {}]   ;;  %s1007_s1 = inlined_call_operand.vmem [shape: f32[8,8], index: 1, kind: input, shape index: {}]   ;;  %s1008_s2 = inlined_call_operand.vmem [shape: f32[32,24], index: 2, kind: input, shape index: {}]   ;;  %s1009_s3 = inlined_call_operand.vmem [shape: f32[32,8], index: 3, kind: input, shape index: {}]   ;;  %s1010_s4 = inlined_call_operand.vmem [shape: f32[32,1], index: 4, kind: input, shape index: {}]   ;;  %s1011_s5 = inlined_call_operand.vmem [shape: f32[32,32], index: 5, kind: input, shape index: {}]   ;;  %s1012_s6 = inlined_call_operand.vmem [shape: f32[32,1], index: 6, kind: input, shape index: {}]   ;;  %s1013_s7 = inlined_call_operand.vmem [shape: f32[32,32], index: 7, kind: input, shape index: {}]   ;;  %s1014_s8 = inlined_call_operand.vmem [shape: f32[32,1], index: 8, kind: input, shape index: {}]   ;;  %s1015_s9 = inlined_call_operand.vmem [shape: f32[1,32], index: 9, kind: input, shape index: {}]   ;;  %s1016_s10 = inlined_call_operand.<no memory space> [shape: f32[1,1], index: 10, kind: input, shape index: {}]   ;;  %s1017_s11 = inlined_call_operand.hbm [shape: f32[1,8], index: 11, kind: output, shape index: {}]  }
   0x1   :  { %v16_v0 = vstv %s1016_s10 }
   0x2   :  { %17 = vst [vmem:[#allocation2] sm:$0x1] %v16_v0 }
   0x3   :  { %v44_v1 = vld [vmem:[%s1007_s1] sm:$0xff]  ;;  %vm53_vm0 = vcmask 64512   ;;  %v50_v3 = vld [vmem:[%s1009_s3 + $0x8] sm:$0xff]  ;;  %v51_v6 = vld [vmem:[%s1009_s3 + $0x10] sm:$0xff]  ;;  %v810_v8 = vmov 0   ;;  %vm151_vm1 = vcmask 195584  }
   0x4   :  { %v49_v2 = vld [vmem:[%s1009_s3] sm:$0xff]  ;;  %690 = vmatprep.subr.mxu0 %v44_v1  ;;  %v42_v5 = vld [vmem:[%s1006_s0 + $0x8] sm:$0xff]  ;;  %784 = vset.pattern.permute.xlu0 %v810_v8  ;;  %v43_v9 = vld [vmem:[%s1006_s0 + $0x10] sm:$0xff] }
   0x5   :  { %692 = vmatprep.mubr.msk.f32.mxu0 %vm53_vm0, %v49_v2  ;;  %v41_v4 = vld [vmem:[%s1006_s0] sm:$0xff]  ;;  %691 = vmatpush3.msra.mxu0 %v44_v1  ;;  %v52_v10 = vld [vmem:[%s1009_s3 + $0x18] sm:$0xff]  ;;  %v251_v12 = vld [vmem:[%s1010_s4 + $0x10] sm:$0xff] }
   0x6   :  { %v749_v7 = vpack.c.bf16 %v42_v5, %v41_v4  ;;  %693 = vmatmul.mubr.msk.f32.vlgmr.msra.gmra.mrb[0].mxu0 %vm53_vm0, %v50_v3  ;;  %785 = vset.pattern.permute.xlu1 %v810_v8  ;;  %v249_v11 = vld [vmem:[%s1010_s4] sm:$0xff]  ;;  %v250_v14 = vld [vmem:[%s1010_s4 + $0x8] sm:$0xff]  ;;  %v252_v15 = vld [vmem:[%s1010_s4 + $0x18] sm:$0xff] }
   0x7   :  { %695 = vmatprep.mubr.msk.f32.mxu0 %vm53_vm0, %v51_v6  ;;  %v45_v13 = vld [vmem:[%s1008_s2] sm:$0xff]  ;;  %255 = vperm.xlu0 %784, %v249_v11   ;;  %v46_v16 = vld [vmem:[%s1008_s2 + $0x8] sm:$0xff] }
   0x8   :  { %750 = vmatprep.subr.bf16.mxu0 %v749_v7  ;;  %265 = vperm.xlu1 %785, %v251_v12  }
   0x9   :  { %752 = vmatpush3.bf16.msra.mxu0 %v749_v7 }
   0xa   :  { %702 = vmatprep.subr.mxu0 %v43_v9  ;;  %696 = vmatmul.mubr.msk.f32.gmra.mrb[2].mxu0 %vm53_vm0, %v52_v10 }
   0xb   :  { %704 = vmatprep.mubr.msk.f32.mxu0 %vm151_vm1, %v45_v13 }
   0xc   :  { %18 = vsyncpa [#allocation4], 0  ;;  %v47_v17 = vld [vmem:[%s1008_s2 + $0x10] sm:$0xff]  ;;  %260 = vperm.xlu0 %784, %v250_v14   ;;  %v285_v18 = vld [vmem:[%s1012_s6] sm:$0xff]  ;;  %270 = vperm.xlu1 %785, %v252_v15   ;;  %vm309_vm2 = vcmask 261120   ;;  %v811_v8 = vmov 0.0|0.0  }
   0xd   :  { %703 = vmatpush3.msra.mxu0 %v43_v9  ;;  %v286_v19 = vld [vmem:[%s1012_s6 + $0x8] sm:$0xff]  ;;  %v48_v20 = vld [vmem:[%s1008_s2 + $0x18] sm:$0xff]  ;;  %v287_v21 = vld [vmem:[%s1012_s6 + $0x10] sm:$0xff]  ;;  %vm812_vm3 = vmmov 0   ;;  %v813_v9 = vmov 0.0   ;;  %s814_s30 = smov [#allocation3]  }
   0xe   :  { %705 = vmatmul.mubr.msk.f32.vlgmr.msra.gmra.mrb[0].mxu0 %vm151_vm1, %v46_v16  ;;  %v288_v22 = vld [vmem:[%s1012_s6 + $0x18] sm:$0xff]  ;;  %v415_v23 = vld [vmem:[%s1014_s8] sm:$0xff]  ;;  %v416_v24 = vld [vmem:[%s1014_s8 + $0x8] sm:$0xff]  ;;  %769 = vmatprep.subr.bf16.mxu0 %v811_v8  ;;  %s632_s12 = sshll.u32 %s814_s30, 4  ;;  %vm624_vm4 = vcmask 57344   ;;  %s633_s12 = int_to_ptr.vmem [resolvable:$true] %s632_s12 }
   0xf   :  { %707 = vmatprep.mubr.msk.f32.mxu0 %vm151_vm1, %v47_v17  ;;  %v417_v25 = vld [vmem:[%s1014_s8 + $0x10] sm:$0xff]  ;;  %v418_v26 = vld [vmem:[%s1014_s8 + $0x18] sm:$0xff]  ;;  %v541_v27 = vld [vmem:[#allocation2] sm:$0x1]  ;;  %s786_s13 = scalar_lea.vmem %s633_s12, 16  ;;  %s790_s14 = scalar_lea.vmem %s633_s12, 32 }
  0x10   :  { %291 = vperm.xlu0 %784, %v285_v18   ;;  %296 = vperm.xlu1 %785, %v286_v19   ;;  %v281_v28 = vld [vmem:[%s1011_s5] sm:$0xff]  ;;  %v282_v47 = vld [vmem:[%s1011_s5 + $0x8] sm:$0xff]  ;;  %v283_v48 = vld [vmem:[%s1011_s5 + $0x10] sm:$0xff]  ;;  %p787_p0 = scmp.ne.s32.totalorder %s633_s12, %s786_s13  ;;  %p791_p1 = scmp.lt.s32.totalorder %s633_s12, %s633_s12 }
  0x11   :  { %718 = vmatprep.mubr.msk.f32.mxu1 %vm309_vm2, %v281_v28  ;;  %v284_v49 = vld [vmem:[%s1011_s5 + $0x18] sm:$0xff]  ;;  %v411_v50 = vld [vmem:[%s1013_s7] sm:$0xff]  ;;  %v412_v5 = vld [vmem:[%s1013_s7 + $0x8] sm:$0xff]  ;;  %p792_p2 = scmp.lt.s32.totalorder %s790_s14, %s786_s13 }
  0x12   :  { %708 = vmatmul.mubr.msk.f32.gmra.mrb[2].mxu0 %vm151_vm1, %v48_v20  ;;  %v413_v6 = vld [vmem:[%s1013_s7 + $0x10] sm:$0xff]  ;;  %v414_v7 = vld [vmem:[%s1013_s7 + $0x18] sm:$0xff]  ;;  %v540_v28 = vld [vmem:[%s1015_s9] sm:$0x1] }
  0x13   :  { %746 = vmatprep.mubr.msk.f32.mxu0 %vm812_vm3, %v813_v9  ;;  %p793_p3 = por %p792_p2, %p791_p1 }
  0x14   :  { %301 = vperm.xlu0 %784, %v287_v21   ;;  %306 = vperm.xlu1 %785, %v288_v22  }
  0x15   :  { %p794_p4 = pnand %p793_p3, %p787_p0 }
  0x18   :  { %421 = vperm.xlu0 %784, %v415_v23   ;;  %426 = vperm.xlu1 %785, %v416_v24  }
  0x1c   :  { %431 = vperm.xlu0 %784, %v417_v25   ;;  %436 = vperm.xlu1 %785, %v418_v26  }
  0x20   :  { %544 = vperm.xlu0 %784, %v541_v27  }
  0x86   :  { %v256_v29 = vpop.permute.xlu0 %255 }
  0x87   :  { %v266_v30 = vpop.permute.xlu1 %265 }
  0x8b   :  { %v261_v31 = vpop.permute.xlu0 %260  ;;  %v271_v37 = vpop.permute.xlu1 %270 }
  0x8f   :  { %v297_v51 = vpop.permute.xlu1 %296  ;;  %v292_v52 = vpop.permute.xlu0 %291 }
  0x93   :  { %v307_v58 = vpop.permute.xlu1 %306  ;;  %v302_v61 = vpop.permute.xlu0 %301 }
  0x97   :  { %v427_v10 = vpop.permute.xlu1 %426  ;;  %v422_v11 = vpop.permute.xlu0 %421 }
  0x9b   :  { %v437_v17 = vpop.permute.xlu1 %436  ;;  %v432_v20 = vpop.permute.xlu0 %431 }
  0xe1   :  { %v706_v32 = vpop.f32.mrb[0].mxu0 }
  0xe2   :  { %v274_v33 = vadd.f32 %v706_v32, %v261_v31  ;;  %v230_v34 = vpop.f32.mrb[1].mxu0  ;;  %v545_v32 = vpop.permute.xlu0 %544 }
  0xe3   :  { %v273_v35 = vadd.f32 %v256_v29, %v230_v34  ;;  %v547_v29 = vlaneseq }
  0xe4   :  { %v278_v36 = vmax.f32 %v274_v33, 0.0 }
  0xe5   :  { %v277_v38 = vmax.f32 %v273_v35, 0.0  ;;  %v709_v39 = vpop.f32.mrb[2].mxu0 }
  0xe6   :  { %v276_v40 = vadd.f32 %v709_v39, %v271_v37  ;;  %v240_v41 = vpop.f32.mrb[3].mxu0 }
  0xe7   :  { %v275_v42 = vadd.f32 %v266_v30, %v240_v41  ;;  %v753_v43 = vpack.c.bf16 %v278_v36, %v277_v38  ;;  %v548_v30 = vshrl.u32 %v547_v29, 7 }
  0xe8   :  { %v280_v44 = vmax.f32 %v276_v40, 0.0 }
  0xe9   :  { %v279_v45 = vmax.f32 %v275_v42, 0.0  ;;  %754 = vmatprep.subr.bf16.mxu1 %v753_v43  ;;  %v549_v31 = vsub.s32 0, %v548_v30 }
  0xea   :  { %756 = vmatpush3.bf16.msra.mxu1 %v753_v43 }
  0xeb   :  { %v757_v46 = vpack.c.bf16 %v280_v44, %v279_v45  ;;  %v550_v33 = vrot.slane %v545_v32, %v549_v31 }
  0xed   :  { %758 = vmatprep.subr.bf16.mxu1 %v757_v46 }
  0xee   :  { %760 = vmatpush3.bf16.msra.mxu1 %v757_v46 }
  0xf1   :  { %719 = vmatmul.mubr.msk.f32.vlgmr.msra.gmra.mrb[0].mxu1 %vm309_vm2, %v282_v47 }
  0xf2   :  { %721 = vmatprep.mubr.msk.f32.mxu1 %vm309_vm2, %v283_v48 }
  0xf5   :  { %722 = vmatmul.mubr.msk.f32.gmra.mrb[2].mxu1 %vm309_vm2, %v284_v49 }
  0xf6   :  { %732 = vmatprep.mubr.msk.f32.mxu1 %vm309_vm2, %v411_v50 }
 0x1c4   :  { %v720_v53 = vpop.f32.mrb[0].mxu1 }
 0x1c5   :  { %v394_v54 = vadd.f32 %v720_v53, %v297_v51  ;;  %v388_v55 = vpop.f32.mrb[1].mxu1 }
 0x1c6   :  { %v389_v56 = vadd.f32 %v388_v55, %v292_v52 }
 0x1c7   :  { %v408_v57 = vmax.f32 %v394_v54, 0.0 }
 0x1c8   :  { %v407_v59 = vmax.f32 %v389_v56, 0.0  ;;  %v723_v60 = vpop.f32.mrb[2].mxu1 }
 0x1c9   :  { %v404_v62 = vadd.f32 %v723_v60, %v307_v58  ;;  %v398_v63 = vpop.f32.mrb[3].mxu1 }
 0x1ca   :  { %v761_v0 = vpack.c.bf16 %v408_v57, %v407_v59  ;;  %v399_v1 = vadd.f32 %v398_v63, %v302_v61 }
 0x1cb   :  { %v410_v2 = vmax.f32 %v404_v62, 0.0 }
 0x1cc   :  { %v409_v3 = vmax.f32 %v399_v1, 0.0  ;;  %762 = vmatprep.subr.bf16.mxu1 %v761_v0 }
 0x1cd   :  { %764 = vmatpush3.bf16.msra.mxu1 %v761_v0 }
 0x1ce   :  { %v765_v4 = vpack.c.bf16 %v410_v2, %v409_v3 }
 0x1d0   :  { %766 = vmatprep.subr.bf16.mxu1 %v765_v4 }
 0x1d1   :  { %768 = vmatpush3.bf16.msra.mxu1 %v765_v4 }
 0x1d4   :  { %733 = vmatmul.mubr.msk.f32.vlgmr.msra.gmra.mrb[4].mxu1 %vm309_vm2, %v412_v5 }
 0x1d5   :  { %735 = vmatprep.mubr.msk.f32.mxu1 %vm309_vm2, %v413_v6 }
 0x1d8   :  { %736 = vmatmul.mubr.msk.f32.gmra.mrb[6].mxu1 %vm309_vm2, %v414_v7 }
 0x2a7   :  { %v734_v12 = vpop.f32.mrb[4].mxu1 }
 0x2a8   :  { %v523_v13 = vadd.f32 %v734_v12, %v427_v10  ;;  %v517_v14 = vpop.f32.mrb[5].mxu1 }
 0x2a9   :  { %v518_v15 = vadd.f32 %v517_v14, %v422_v11 }
 0x2aa   :  { %v537_v16 = vmax.f32 %v523_v13, 0.0 }
 0x2ab   :  { %v536_v18 = vmax.f32 %v518_v15, 0.0  ;;  %v737_v19 = vpop.f32.mrb[6].mxu1 }
 0x2ac   :  { %v533_v21 = vadd.f32 %v737_v19, %v437_v17  ;;  %v527_v22 = vpop.f32.mrb[7].mxu1 }
 0x2ad   :  { %v770_v23 = vpack.c.bf16 %v537_v16, %v536_v18  ;;  %v528_v24 = vadd.f32 %v527_v22, %v432_v20 }
 0x2ae   :  { %v539_v25 = vmax.f32 %v533_v21, 0.0 }
 0x2af   :  { %v538_v26 = vmax.f32 %v528_v24, 0.0  ;;  %771 = vmatpush3.bf16.msra.mxu0 %v770_v23 }
 0x2b0   :  { %772 = vmatprep.subr.bf16.mxu0 %v811_v8 }
 0x2b1   :  { %v773_v27 = vpack.c.bf16 %v539_v25, %v538_v26 }
 0x2b3   :  { %774 = vmatpush3.bf16.msra.mxu0 %v773_v27 }
 0x2b6   :  { %747 = vmatmul.mubr.msk.f32.vlgmr.msra.gmra.mrb[4].mxu0 %vm309_vm2, %v540_v28 }
 0x389   :  { %v620_v34 = vpop.f32.mrb[4].mxu0 }
 0x38a   :  { %v621_v35 = vadd.f32 %v620_v34, %v550_v33  ;;  %v748_v36 = vpop.f32.mrb[5].mxu0 }
 0x38c   :  { %625 = vst.msk [vmem:[#allocation3] sm:$0x1] %vm624_vm4, %v621_v35 }
 0x38d   :  { %797 = shalt.err (!%p794_p4)
}
 0x38e   :  { %s798_s16 = scalar_lea.hbm %s1017_s11, 16 }
 0x38f   :  { %p799_p5 = scmp.ne.s32.totalorder %s1017_s11, %s798_s16  ;;  %p802_p6 = scmp.lt.u32.totalorder %s798_s16, %s1017_s11 }
 0x391   :  { %p804_p7 = pnand %p802_p6, %p799_p5 }
 0x393   :  { %807 = shalt.err (!%p804_p7)
}
 0x394   :  { %635 = dma.vmem_to_hbm [thread:$0]  %s633_s12, 16, %s1017_s11, [#allocation4]  }
 0x395   :  { %808 = dma.done.wait [#allocation4], 16  }
 0x396   :  { %809 = vsyncadd [#allocation4], 4294967280 }
 0x397   :  { %639 = vsyncpa [#allocation4], 1 }

</bundles_post_ra>
